<compile_context>
chip_gen: v6e
topology: v6e:2x2x1
jax: 0.10.0
libtpu: 0.0.40
codegen_flags: <defaults>
</compile_context>

<pallas_src>
import functools

import jax
import jax.numpy as jnp
from jax.experimental import pallas as pl
from jax.experimental.pallas import tpu as pltpu

LANES = 128
SUBLANES = 8


def _rmse_kernel(x_ref, y_ref, o_ref, acc_ref, *,
                 total_n, valid_rows, tile_rows, need_mask):
    i = pl.program_id(0)

    @pl.when(i == 0)
    def _():
        acc_ref[...] = jnp.zeros_like(acc_ref)

    # Hot path: native-dtype loads, f32 accumulation, VPU-only partial sums.
    d = x_ref[...].astype(jnp.float32) - y_ref[...].astype(jnp.float32)
    dd = d * d

    if need_mask:
        # Mask rows of the last (over-hanging) tile that lie past the real data.
        row_ids = i * tile_rows + jax.lax.broadcasted_iota(
            jnp.int32, (tile_rows, LANES), 0)
        dd = jnp.where(row_ids < valid_rows, dd, 0.0)

    # (tile_rows, 128) -> (tile_rows//8, 8, 128); reduce leading axis = pure
    # elementwise vreg adds (no XLU work in the loop).
    acc_ref[...] += jnp.sum(dd.reshape(tile_rows // SUBLANES, SUBLANES, LANES),
                            axis=0)

    @pl.when(i == pl.num_programs(0) - 1)
    def _():
        # One cross-lane/sublane reduce total, then mean + sqrt.
        total = jnp.sum(acc_ref[...], keepdims=True)  # (1, 1)
        o_ref[...] = jnp.sqrt(total / jnp.float32(total_n))


def rmse_loss(x, y, *, tile_rows=1024):
    """sqrt(mean((x - y)^2)) — matches torch.sqrt(nn.MSELoss()(x, y))."""
    assert x.shape == y.shape, "RMSELoss expects matching shapes"
    n = x.size  # true element count for the mean

    xf = jnp.ravel(x)
    yf = jnp.ravel(y)

    # Only pad (full-copy) when n is not a multiple of 8*128; zero diffs
    # contribute nothing to the sum so correctness is unaffected.
    pad = (-n) % (SUBLANES * LANES)
    if pad:
        xf = jnp.pad(xf, (0, pad))
        yf = jnp.pad(yf, (0, pad))

    rows = (n + pad) // LANES          # multiple of 8
    x2 = xf.reshape(rows, LANES)
    y2 = yf.reshape(rows, LANES)

    # Clamp tile to the data size; keep it a multiple of 8 sublanes.
    tile_rows = max(SUBLANES, min(tile_rows, rows))
    tile_rows = (tile_rows // SUBLANES) * SUBLANES
    num_tiles = pl.cdiv(rows, tile_rows)
    need_mask = (rows % tile_rows) != 0

    kernel = functools.partial(
        _rmse_kernel,
        total_n=n,
        valid_rows=rows,
        tile_rows=tile_rows,
        need_mask=need_mask,
    )

    out = pl.pallas_call(
        kernel,
        out_shape=jax.ShapeDtypeStruct((1, 1), jnp.float32),
        grid_spec=pltpu.PrefetchScalarGridSpec(
            num_scalar_prefetch=0,
            grid=(num_tiles,),
            in_specs=[
                pl.BlockSpec((tile_rows, LANES), lambda i: (i, 0)),
                pl.BlockSpec((tile_rows, LANES), lambda i: (i, 0)),
            ],
            out_specs=pl.BlockSpec((1, 1), lambda i: (0, 0)),
            scratch_shapes=[pltpu.VMEM((SUBLANES, LANES), jnp.float32)],
        ),
        compiler_params=pltpu.CompilerParams(
            dimension_semantics=("arbitrary",),
        ),
    )(x2, y2)

    # PyTorch returns a 0-dim tensor; mirror that with a scalar array.
    return out[0, 0]


if __name__ == "__main__":
    key = jax.random.PRNGKey(0)
    k1, k2 = jax.random.split(key)
    x = jax.random.normal(k1, (2, 4, 16, 16), dtype=jnp.float32)
    y = jax.random.normal(k2, (2, 4, 16, 16), dtype=jnp.float32)

    loss = jax.block_until_ready(rmse_loss(x, y))

    # reference check (plain JAX)
    ref = jnp.sqrt(jnp.mean((x - y) ** 2))
    assert jnp.allclose(loss, ref, rtol=1e-6, atol=1e-6), (loss, ref)

    # quick check of the ragged-tail / masking path with an unaligned shape
    x3 = jax.random.normal(k1, (3, 5, 7), dtype=jnp.float32)
    y3 = jax.random.normal(k2, (3, 5, 7), dtype=jnp.float32)
    loss3 = jax.block_until_ready(rmse_loss(x3, y3, tile_rows=8))
    ref3 = jnp.sqrt(jnp.mean((x3 - y3) ** 2))
    assert jnp.allclose(loss3, ref3, rtol=1e-6, atol=1e-6), (loss3, ref3)

    print("KERNEL_OK")
</pallas_src>

<mosaic_0001>
module attributes {stable_mosaic.version = 11 : i64} {
  func.func @_rmse_kernel(%arg0: i32, %arg1: memref<16x128xf32, #tpu.memory_space<vmem>>, %arg2: memref<16x128xf32, #tpu.memory_space<vmem>>, %arg3: memref<1x1xf32, #tpu.memory_space<vmem>>, %arg4: memref<8x128xf32, #tpu.memory_space<vmem>>) attributes {dimension_semantics = [#tpu.dimension_semantics<arbitrary>], iteration_bounds = array<i64: 1>, scalar_prefetch = 0 : i64, scratch_operands = 1 : i64, tpu.core_type = #tpu.core_type<tc>, window_params = [{transform_indices = @transform_0, window_bounds = array<i64: 16, 128>}, {transform_indices = @transform_1, window_bounds = array<i64: 16, 128>}, {pipeline_mode = #tpu.pipeline_mode<synchronous>, transform_indices = @transform_2, window_bounds = array<i64: 1, 1>}]} {
    %c0_i32 = arith.constant 0 : i32
    %0 = arith.cmpi eq, %arg0, %c0_i32 : i32
    %1 = arith.extui %0 : i1 to i32
    %c0_i32_0 = arith.constant 0 : i32
    %2 = arith.cmpi ne, %1, %c0_i32_0 : i32
    scf.if %2 {
      %cst_10 = arith.constant 0.000000e+00 : f32
      %15 = vector.broadcast %cst_10 : f32 to vector<8x128xf32>
      %c0_11 = arith.constant 0 : index
      %c0_12 = arith.constant 0 : index
      %16 = vector.load %arg4[%c0_11, %c0_12] : memref<8x128xf32, #tpu.memory_space<vmem>>, vector<8x128xf32>
      tpu.vector_store %arg4[%c0_11, %c0_12], %15 {strides = array<i32>} : memref<8x128xf32, #tpu.memory_space<vmem>>, vector<8x128xf32>,
    } else {
    }
    %c0 = arith.constant 0 : index
    %c0_1 = arith.constant 0 : index
    %3 = vector.load %arg1[%c0, %c0_1] : memref<16x128xf32, #tpu.memory_space<vmem>>, vector<16x128xf32>
    %c0_2 = arith.constant 0 : index
    %c0_3 = arith.constant 0 : index
    %4 = vector.load %arg2[%c0_2, %c0_3] : memref<16x128xf32, #tpu.memory_space<vmem>>, vector<16x128xf32>
    %5 = arith.subf %3, %4 : vector<16x128xf32>
    %6 = arith.mulf %5, %5 : vector<16x128xf32>
    %c0_4 = arith.constant 0 : index
    %c0_5 = arith.constant 0 : index
    %7 = vector.load %arg4[%c0_4, %c0_5] : memref<8x128xf32, #tpu.memory_space<vmem>>, vector<8x128xf32>
    %8 = vector.shape_cast %6 : vector<16x128xf32> to vector<2x8x128xf32>
    %cst = arith.constant dense<0.000000e+00> : vector<8x128xf32>
    %9 = vector.multi_reduction <add>, %8, %cst [0] : vector<2x8x128xf32> to vector<8x128xf32>
    %10 = arith.addf %7, %9 : vector<8x128xf32>
    %c0_6 = arith.constant 0 : index
    %c0_7 = arith.constant 0 : index
    %11 = vector.load %arg4[%c0_6, %c0_7] : memref<8x128xf32, #tpu.memory_space<vmem>>, vector<8x128xf32>
    tpu.vector_store %arg4[%c0_6, %c0_7], %10 {strides = array<i32>} : memref<8x128xf32, #tpu.memory_space<vmem>>, vector<8x128xf32>,
    %c0_i32_8 = arith.constant 0 : i32
    %12 = arith.cmpi eq, %arg0, %c0_i32_8 : i32
    %13 = arith.extui %12 : i1 to i32
    %c0_i32_9 = arith.constant 0 : i32
    %14 = arith.cmpi ne, %13, %c0_i32_9 : i32
    scf.if %14 {
      %c0_10 = arith.constant 0 : index
      %c0_11 = arith.constant 0 : index
      %15 = vector.load %arg4[%c0_10, %c0_11] : memref<8x128xf32, #tpu.memory_space<vmem>>, vector<8x128xf32>
      %16 = vector.shape_cast %15 : vector<8x128xf32> to vector<1x8x128xf32>
      %cst_12 = arith.constant dense<0.000000e+00> : vector<1xf32>
      %17 = vector.multi_reduction <add>, %16, %cst_12 [1, 2] : vector<1x8x128xf32> to vector<1xf32>
      %18 = vector.shape_cast %17 : vector<1xf32> to vector<1x1x1xf32>
      %19 = vector.extract %18[0, 0, 0] : f32 from vector<1x1x1xf32>
      %20 = vector.broadcast %19 : f32 to vector<1x1xf32>
      %cst_13 = arith.constant 2.048000e+03 : f32
      %21 = vector.broadcast %cst_13 : f32 to vector<1x1xf32>
      %22 = arith.divf %20, %21 : vector<1x1xf32>
      %23 = math.sqrt %22 : vector<1x1xf32>
      %c0_14 = arith.constant 0 : index
      %c0_15 = arith.constant 0 : index
      %24 = vector.load %arg3[%c0_14, %c0_15] : memref<1x1xf32, #tpu.memory_space<vmem>>, vector<1x1xf32>
      tpu.vector_store %arg3[%c0_14, %c0_15], %23 {strides = array<i32>} : memref<1x1xf32, #tpu.memory_space<vmem>>, vector<1x1xf32>,
    } else {
    }
    return
  }
  func.func @transform_0(%arg0: i32) -> (i32, i32) {
    %c0_i32 = arith.constant 0 : i32
    %c0_i32_0 = arith.constant 0 : i32
    return %arg0, %c0_i32 : i32, i32
  }
  func.func @transform_1(%arg0: i32) -> (i32, i32) {
    %c0_i32 = arith.constant 0 : i32
    %c0_i32_0 = arith.constant 0 : i32
    return %arg0, %c0_i32 : i32, i32
  }
  func.func @transform_2(%arg0: i32) -> (i32, i32) {
    %c0_i32 = arith.constant 0 : i32
    %c0_i32_0 = arith.constant 0 : i32
    %c0_i32_1 = arith.constant 0 : i32
    return %c0_i32, %c0_i32_0 : i32, i32
  }
}

</mosaic_0001>

<bundles_post_ra>
// kernel: tpu_custom_call.1
= control target key start
LH: loop header
LB: loop body
LE: loop exit
PB: predicated region body
PF: predicated region fallthrough
CT: control target
= control target key end

     0   :  { %7 = vsyncpa [#allocation4], 0  ;;  %s202_s0 = inlined_call_operand.hbm [shape: f32[16,128], index: 0, kind: input, shape index: {}]   ;;  %s203_s1 = inlined_call_operand.hbm [shape: f32[16,128], index: 1, kind: input, shape index: {}]   ;;  %s204_s2 = inlined_call_operand.hbm [shape: f32[1,1], index: 2, kind: output, shape index: {}]  }
   0x1   :  { %8 = vsyncpa [#allocation7], 0 }
   0x2   :  { %9 = vsyncpa [#allocation5], 0  ;;  %s173_s9 = smov [#allocation3]  }
   0x3   :  { %s15_s10 = sshll.u32 %s173_s9, 4  ;;  %s16_s10 = int_to_ptr.vmem [resolvable:$true] %s15_s10 }
   0x4   :  { %s115_s11 = scalar_lea.vmem %s16_s10, 256  ;;  %p120_p1 = scmp.lt.s32.totalorder %s16_s10, %s16_s10 }
   0x5   :  { %p116_p0 = scmp.ne.s32.totalorder %s16_s10, %s115_s11  ;;  %p121_p2 = scmp.lt.s32.totalorder %s115_s11, %s115_s11 }
   0x7   :  { %p122_p3 = por %p121_p2, %p120_p1 }
   0x9   :  { %p123_p4 = pnand %p122_p3, %p116_p0 }
   0xb   :  { %126 = shalt.err (!%p123_p4)
}
   0xc   :  { %s174_s12 = smov 128   ;;  %s175_s13 = smov 8  }
   0xd   :  { %21 = dma.hbm_to_vmem [thread:$0]  %s202_s0, 256, %s16_s10, [#allocation4], %s174_s12, %s174_s12, %s175_s13  }
   0xe   :  { %s176_s16 = smov [#allocation6]  }
   0xf   :  { %s27_s17 = sshll.u32 %s176_s16, 4  ;;  %s28_s17 = int_to_ptr.vmem [resolvable:$true] %s27_s17 }
  0x10   :  { %s135_s18 = scalar_lea.vmem %s28_s17, 256  ;;  %p140_p6 = scmp.lt.s32.totalorder %s28_s17, %s28_s17 }
  0x11   :  { %p136_p5 = scmp.ne.s32.totalorder %s28_s17, %s135_s18  ;;  %p141_p7 = scmp.lt.s32.totalorder %s135_s18, %s135_s18 }
  0x13   :  { %p142_p8 = por %p141_p7, %p140_p6 }
  0x15   :  { %p143_p9 = pnand %p142_p8, %p136_p5 }
  0x17   :  { %146 = shalt.err (!%p143_p9)
}
  0x18   :  { %33 = dma.hbm_to_vmem [thread:$0]  %s203_s1, 256, %s28_s17, [#allocation7], %s174_s12, %s174_s12, %s175_s13  }
  0x19   :  { %167 = dma.done.wait [#allocation4], 256  }
  0x1a   :  { %168 = vsyncadd [#allocation4], 4294967040 }
  0x1b   :  { %169 = dma.done.wait [#allocation7], 256  }
  0x1c   :  { %170 = vsyncadd [#allocation7], 4294967040  ;;  %v45_v0 = vld [vmem:[#allocation3] sm:$0xff]  ;;  %v46_v1 = vld [vmem:[#allocation3 + $0x8] sm:$0xff]  ;;  %s177_s1 = smov [#allocation8]   ;;  %vm80_vm1 = vcmask 0  }
  0x1d   :  { %v47_v2 = vld [vmem:[#allocation6] sm:$0xff]  ;;  %v48_v3 = vld [vmem:[#allocation6 + $0x8] sm:$0xff]  ;;  %s88_s21 = sshll.u32 %s177_s1, 4  ;;  %s89_s21 = int_to_ptr.vmem [resolvable:$true] %s88_s21 }
  0x1e   :  { %v49_v4 = vsub.f32 %v45_v0, %v47_v2  ;;  %v50_v5 = vsub.f32 %v46_v1, %v48_v3  ;;  %s147_s22 = scalar_lea.vmem %s89_s21, 16  ;;  %s151_s23 = scalar_lea.vmem %s89_s21, 32 }
  0x1f   :  { %p148_p10 = scmp.ne.s32.totalorder %s89_s21, %s147_s22  ;;  %p152_p11 = scmp.lt.s32.totalorder %s89_s21, %s89_s21 }
  0x20   :  { %v51_v6 = vmul.f32 %v49_v4, %v49_v4  ;;  %v52_v7 = vmul.f32 %v50_v5, %v50_v5  ;;  %p153_p12 = scmp.lt.s32.totalorder %s151_s23, %s147_s22 }
  0x22   :  { %v54_v8 = vadd.f32 %v52_v7, %v51_v6  ;;  %p154_p13 = por %p153_p12, %p152_p11 }
  0x24   :  { %61 = vadd.xlane.f32.xlu0 %v54_v8  ;;  %p155_p0 = pnand %p154_p13, %p148_p10 }
  0xad   :  { %v62_v9 = vpop.xlane.xlu0 %61 }
  0xae   :  { %v63_v10 = vrot.slane %v62_v9, 4 }
  0xb0   :  { %v64_v11 = vadd.f32 %v63_v10, %v62_v9 }
  0xb2   :  { %v65_v12 = vrot.slane %v64_v11, 2 }
  0xb4   :  { %v66_v13 = vadd.f32 %v65_v12, %v64_v11 }
  0xb6   :  { %v67_v14 = vrot.slane %v66_v13, 1 }
  0xb8   :  { %v68_v15 = vadd.f32 %v67_v14, %v66_v13 }
  0xba   :  { %98 = vpush %v68_v15 }
  0xeb   :  { %s99_s0 = spop %98 }
  0xec   :  { %v70_v16 = vstv %s99_s0 }
  0xed   :  { %v72_v17 = vmul.f32 0.00048828125, %v70_v16 }
  0xef   :  { %105 = vrsqrt.f32 %v72_v17  ;;  %vm75_vm0 = vcmp.eq.f32.partialorder %v72_v17, inf  ;;  %v78_v20 = vand.u32 2147483648, %v72_v17  ;;  %vm77_vm2 = vcmp.eq.f32.partialorder %v72_v17, 0.0 }
  0xfc   :  { %v106_v18 = vpop.eup %105 }
  0xfd   :  { %v74_v19 = vmul.f32 %v106_v18, %v72_v17 }
  0xff   :  { %v76_v21 = vsel %vm75_vm0, %v72_v17, %v74_v19 }
 0x100   :  { %v79_v22 = vsel %vm77_vm2, %v78_v20, %v76_v21 }
 0x101   :  { %81 = vst.msk [vmem:[#allocation8] sm:$0x1] %vm80_vm1, %v79_v22 }
 0x102   :  { %158 = shalt.err (!%p155_p0)
}
 0x103   :  { %91 = dma.vmem_to_hbm [thread:$0]  %s89_s21, 16, %s204_s2, [#allocation5]  }
 0x104   :  { %171 = dma.done.wait [#allocation5], 16  }
 0x105   :  { %172 = vsyncadd [#allocation5], 4294967280 }
 0x106   :  { %95 = vsyncpa [#allocation4], 1 }
 0x107   :  { %96 = vsyncpa [#allocation7], 1 }
 0x108   :  { %97 = vsyncpa [#allocation5], 1 }

</bundles_post_ra>
